<compile_context>
chip_gen: v5e
topology: v5e:2x2
jax: 0.10.0
libtpu: 0.0.40
codegen_flags: <defaults>
</compile_context>

<pallas_src>
import jax
import jax.numpy as jnp
from jax.experimental import pallas as pl
from jax.experimental.pallas import tpu as pltpu


def _round_up(x, m):
    return (x + m - 1) // m * m


# ---------------------------------------------------------------------------
# Generic parallel "A @ W + bias" kernel (embedding/input projection and vocab
# projection).  `resident` picks which operand stays resident across the inner
# grid sweep (i.e. which operand is streamed through HBM exactly once).
# ---------------------------------------------------------------------------
def matmul_bias_kernel(a_ref, w_ref, b_ref, o_ref):
    acc = jnp.dot(a_ref[...], w_ref[...], preferred_element_type=jnp.float32)
    o_ref[...] = (acc + b_ref[...].astype(jnp.float32)).astype(o_ref.dtype)


def matmul_bias(a, w, bias, *, out_dtype=jnp.float32, resident="a",
                tm_max=512, tn_max=1024, vmem_budget_bytes=48 * 1024 * 1024):
    """a: (M, K), w: (K, N), bias: (1, N) -> (M, N) in out_dtype.  K is untiled.

    resident="a": A row-tile stays resident, W re-streamed (use when A is the big operand,
                  e.g. the embedding / activation pre-projection).
    resident="w": W column-panel stays resident and is streamed once (use when W is the
                  big operand, e.g. the H x V vocab projection).
    vmem_budget_bytes keeps the double-buffered working set v7x-safe (64 MiB VMEM).
    """
    M, K = a.shape
    _, N = w.shape

    tm = min(tm_max, _round_up(M, 16))
    tn = min(tn_max, _round_up(N, 128))

    def _vmem_est(tm_, tn_):
        return 2 * (tm_ * K * a.dtype.itemsize
                    + K * tn_ * w.dtype.itemsize
                    + tn_ * bias.dtype.itemsize
                    + tm_ * tn_ * jnp.dtype(out_dtype).itemsize)

    # Shrink tiles until the double-buffered working set fits the budget.
    while _vmem_est(tm, tn) > vmem_budget_bytes and (tm > 16 or tn > 128):
        if tn > 128 and (tn >= tm or tm <= 16):
            tn = max(128, (tn // 2) // 128 * 128)
        else:
            tm = max(16, (tm // 2) // 16 * 16)

    M_pad = _round_up(M, tm)
    N_pad = _round_up(N, tn)
    a_p = a if M_pad == M else jnp.pad(a, ((0, M_pad - M), (0, 0)))
    w_p = w if N_pad == N else jnp.pad(w, ((0, 0), (0, N_pad - N)))
    b_p = bias if N_pad == N else jnp.pad(bias, ((0, 0), (0, N_pad - N)))

    grid_m, grid_n = M_pad // tm, N_pad // tn
    if resident == "a":
        # inner axis sweeps N: A row-tile constant across the inner sweep.
        grid = (grid_m, grid_n)
        a_map = lambda i, j: (i, 0)
        w_map = lambda i, j: (0, j)
        b_map = lambda i, j: (0, j)
        o_map = lambda i, j: (i, j)
    else:
        # inner axis sweeps M: W column-panel constant -> big W streamed once total.
        grid = (grid_n, grid_m)
        a_map = lambda j, i: (i, 0)
        w_map = lambda j, i: (0, j)
        b_map = lambda j, i: (0, j)
        o_map = lambda j, i: (i, j)

    vmem_limit = min(max(_vmem_est(tm, tn) + (4 << 20), 32 << 20), 128 << 20)

    out = pl.pallas_call(
        matmul_bias_kernel,
        out_shape=jax.ShapeDtypeStruct((M_pad, N_pad), out_dtype),
        grid_spec=pltpu.PrefetchScalarGridSpec(
            num_scalar_prefetch=0,
            grid=grid,
            in_specs=[
                pl.BlockSpec((tm, K), a_map),
                pl.BlockSpec((K, tn), w_map),
                pl.BlockSpec((1, tn), b_map),
            ],
            out_specs=pl.BlockSpec((tm, tn), o_map),
        ),
        compiler_params=pltpu.CompilerParams(
            dimension_semantics=("parallel", "parallel"),
            vmem_limit_bytes=vmem_limit),
    )(a_p, w_p, b_p)

    if M_pad != M or N_pad != N:
        out = out[:M, :N]
    return out


# ---------------------------------------------------------------------------
# Sequential LSTM recurrence.  Time-major gate inputs arrive precomputed; only
# h @ W_hh remains on the serial critical path.  W_hh is held as a single VMEM
# copy (no double buffering); h/c state lives in f32 VMEM scratch.
# ---------------------------------------------------------------------------
def lstm_recurrent_kernel(gx_ref, whh_any, h_out_ref, whh_scr, h_scr, c_scr):
    # gx_ref   : (tc, B_shard, 4H)  compute-dtype, time-major gate pre-activations
    # whh_any  : (H, 4H)            un-blocked (pl.ANY) recurrent weights
    # h_out_ref: (tc, B_shard, H)   time-major hidden-state output slab
    # whh_scr  : (H, 4H)            single resident VMEM copy of W_hh
    # h_scr/c_scr: (B_shard, H) f32 state carried across T-chunk grid steps
    @pl.when(pl.program_id(1) == 0)
    def _init():
        pltpu.sync_copy(whh_any, whh_scr)      # fetch W_hh once per batch shard
        h_scr[...] = jnp.zeros_like(h_scr)
        c_scr[...] = jnp.zeros_like(c_scr)

    H = h_scr.shape[-1]
    tc = gx_ref.shape[0]
    whh = whh_scr[...]

    def sigm(x):  # sigmoid via tanh: one EUP op per gate
        return 0.5 * jnp.tanh(0.5 * x) + 0.5

    def step(t, carry):
        h, c = carry                                        # f32 (B_shard, H)
        gx = gx_ref[t].astype(jnp.float32)                  # leading-axis slab read
        gates = gx + jnp.dot(h.astype(whh.dtype), whh,
                             preferred_element_type=jnp.float32)
        # PyTorch gate ordering: i, f, g, o
        i_g = sigm(gates[:, 0:H])
        f_g = sigm(gates[:, H:2 * H])
        g_g = jnp.tanh(gates[:, 2 * H:3 * H])
        o_g = sigm(gates[:, 3 * H:4 * H])
        c = f_g * c + i_g * g_g
        h = o_g * jnp.tanh(c)
        h_out_ref[t] = h.astype(h_out_ref.dtype)            # lane-dense leading-axis store
        return (h, c)

    h, c = jax.lax.fori_loop(0, tc, step, (h_scr[...], c_scr[...]), unroll=True)
    h_scr[...] = h
    c_scr[...] = c


def token_lstm_forward(sequences, params, *, t_chunk=16, batch_shards=1,
                       compute_dtype=jnp.bfloat16):
    """sequences: (B, T) int32. Returns logits (B, T, V) float32.

    t_chunk: timesteps per sequential grid step (rounded to a multiple of 8; keep 8-16).
    batch_shards: leading 'parallel' grid axis over batch. Only set >1 (e.g. 2 on v7x)
      when B is large enough to fill both cores' MXUs (B >= 512); otherwise it just
      duplicates W_hh and pipeline buffers in each core's VMEM for no latency win.
    compute_dtype: MXU operand dtype (bf16 recommended; f32 only for tight checks).
    """
    emb = params["embedding"]            # (V, E)
    wih = params["w_ih"]                 # (E, 4H)
    whh = params["w_hh"]                 # (H, 4H)
    b = params["b"]                      # (1, 4H)  = b_ih + b_hh
    wout = params["w_out"]               # (H, V)
    bout = params["b_out"]               # (1, V)

    B, T = sequences.shape
    V, E = emb.shape
    H = whh.shape[0]
    cdt = compute_dtype

    # (1)+(2) Input projection hoisted out of the recurrence, produced time-major.
    if B * T >= V:
        emb_proj = matmul_bias(emb.astype(cdt), wih.astype(cdt), b,
                               out_dtype=cdt, resident="a")           # (V, 4H)
        gates_x = jnp.take(emb_proj, sequences.T, axis=0)             # (T, B, 4H)
    else:
        x = jnp.take(emb.astype(cdt), sequences.T, axis=0)            # (T, B, E)
        gx_flat = matmul_bias(x.reshape(T * B, E), wih.astype(cdt), b,
                              out_dtype=cdt, resident="a")            # (T*B, 4H)
        gates_x = gx_flat.reshape(T, B, 4 * H)

    # (3) Time chunking (tc is a multiple of 8; prefer t_chunk dividing T to avoid padding
    #     the (T, B, 4H) activation).
    tc = min(_round_up(max(t_chunk, 8), 8), _round_up(T, 8))
    T_pad = _round_up(T, tc)
    if T_pad != T:
        gates_x = jnp.pad(gates_x, ((0, T_pad - T), (0, 0), (0, 0)))

    assert B % batch_shards == 0, "batch_shards must divide B"
    B_shard = B // batch_shards

    whh_c = whh.astype(cdt)

    # Explicit VMEM budget for the recurrent kernel (gx + h_out blocks double-buffered,
    # single W_hh copy, f32 state).
    esz = jnp.dtype(cdt).itemsize
    rec_vmem = (2 * (tc * B_shard * 4 * H * esz + tc * B_shard * H * esz)
                + H * 4 * H * esz + 2 * B_shard * H * 4 + (4 << 20))
    rec_vmem = min(max(rec_vmem, 32 << 20), 128 << 20)

    # (4) Sequential recurrence -> time-major hidden states (T_pad, B, H).
    h_seq = pl.pallas_call(
        lstm_recurrent_kernel,
        out_shape=jax.ShapeDtypeStruct((T_pad, B, H), cdt),
        grid_spec=pltpu.PrefetchScalarGridSpec(
            num_scalar_prefetch=0,
            grid=(batch_shards, T_pad // tc),
            in_specs=[
                pl.BlockSpec((tc, B_shard, 4 * H), lambda bi, ti: (ti, bi, 0)),
                pl.BlockSpec(memory_space=pl.ANY),   # W_hh: no auto-DMA / no double buffer
            ],
            out_specs=pl.BlockSpec((tc, B_shard, H), lambda bi, ti: (ti, bi, 0)),
            scratch_shapes=[
                pltpu.VMEM((H, 4 * H), cdt),          # resident W_hh (single copy)
                pltpu.VMEM((B_shard, H), jnp.float32),  # h state
                pltpu.VMEM((B_shard, H), jnp.float32),  # c state
            ],
        ),
        compiler_params=pltpu.CompilerParams(
            dimension_semantics=("parallel", "arbitrary"),
            vmem_limit_bytes=rec_vmem),
    )(gates_x, whh_c)

    # (5) Vocab projection: transpose the small H-wide hidden states back to batch-major
    #     (cheap) and stream the big W_out panel exactly once (resident="w").
    h_bt = jnp.transpose(h_seq[:T], (1, 0, 2)).reshape(B * T, H)      # (B*T, H) cdt
    logits_flat = matmul_bias(h_bt, wout.astype(cdt), bout,
                              out_dtype=jnp.float32, resident="w")    # (B*T, V)
    return logits_flat.reshape(B, T, V)


# ---------------------------------------------------------------------------
# Pure-JAX f32 reference (lax.scan LSTM) for the correctness check.
# ---------------------------------------------------------------------------
def reference_forward(sequences, params):
    emb, wih, whh, b = params["embedding"], params["w_ih"], params["w_hh"], params["b"]
    wout, bout = params["w_out"], params["b_out"]
    H = whh.shape[0]
    x = jnp.take(emb, sequences, axis=0)           # (B, T, E)
    B = x.shape[0]

    def step(carry, xt):
        h, c = carry
        gates = xt @ wih + h @ whh + b
        i = jax.nn.sigmoid(gates[:, 0:H])
        f = jax.nn.sigmoid(gates[:, H:2 * H])
        g = jnp.tanh(gates[:, 2 * H:3 * H])
        o = jax.nn.sigmoid(gates[:, 3 * H:4 * H])
        c = f * c + i * g
        h = o * jnp.tanh(c)
        return (h, c), h

    h0 = jnp.zeros((B, H), jnp.float32)
    c0 = jnp.zeros((B, H), jnp.float32)
    _, hs = jax.lax.scan(step, (h0, c0), jnp.transpose(x, (1, 0, 2)))
    lstm_out = jnp.transpose(hs, (1, 0, 2))        # (B, T, H)
    return lstm_out @ wout + bout                  # (B, T, V)


def init_params(key, vocab_size, embedding_dim, hidden_size):
    ks = jax.random.split(key, 7)
    bound = 1.0 / jnp.sqrt(hidden_size)
    return {
        "embedding": jax.random.normal(ks[0], (vocab_size, embedding_dim), jnp.float32),
        # PyTorch stores weight_ih as (4H, E); we keep the transposed (E, 4H) for x @ W.
        "w_ih": jax.random.uniform(ks[1], (embedding_dim, 4 * hidden_size),
                                   jnp.float32, -bound, bound),
        "w_hh": jax.random.uniform(ks[2], (hidden_size, 4 * hidden_size),
                                   jnp.float32, -bound, bound),
        # combined b_ih + b_hh
        "b": jax.random.uniform(ks[3], (1, 4 * hidden_size), jnp.float32, -bound, bound),
        "w_out": jax.random.uniform(ks[4], (hidden_size, vocab_size),
                                    jnp.float32, -bound, bound),
        "b_out": jax.random.uniform(ks[5], (1, vocab_size), jnp.float32, -bound, bound),
    }


if __name__ == "__main__":
    VOCAB, EMBED, HIDDEN = 128, 32, 32
    B, T = 2, 8

    key = jax.random.PRNGKey(0)
    k_param, k_seq = jax.random.split(key)
    params = init_params(k_param, VOCAB, EMBED, HIDDEN)
    sequences = jax.random.randint(k_seq, (B, T), 0, VOCAB, dtype=jnp.int32)

    ref = jax.block_until_ready(reference_forward(sequences, params))

    # f32 compute path: tight check against the f32 JAX reference.
    out_f32 = jax.block_until_ready(
        token_lstm_forward(sequences, params, compute_dtype=jnp.float32))
    assert out_f32.shape == (B, T, VOCAB), out_f32.shape
    assert jnp.allclose(out_f32, ref, atol=1e-4, rtol=1e-4), "f32 mismatch vs reference"

    # bf16 compute path (production default): looser tolerance for bf16 rounding through
    # the recurrence (structural bugs would show O(1) errors, far above this).
    out_bf16 = jax.block_until_ready(token_lstm_forward(sequences, params))
    assert out_bf16.shape == (B, T, VOCAB), out_bf16.shape
    assert jnp.allclose(out_bf16, ref, atol=1e-1, rtol=1e-1), "bf16 mismatch vs reference"

    print("KERNEL_OK")
</pallas_src>

<mosaic_0001>
module attributes {stable_mosaic.version = 11 : i64} {
  func.func @matmul_bias_kernel(%arg0: i32, %arg1: i32, %arg2: memref<16x32xf32, #tpu.memory_space<vmem>>, %arg3: memref<32x128xf32, #tpu.memory_space<vmem>>, %arg4: memref<1x128xf32, #tpu.memory_space<vmem>>, %arg5: memref<16x128xf32, #tpu.memory_space<vmem>>) attributes {dimension_semantics = [#tpu.dimension_semantics<parallel>, #tpu.dimension_semantics<parallel>], iteration_bounds = array<i64: 1, 1>, scalar_prefetch = 0 : i64, scratch_operands = 0 : i64, tpu.core_type = #tpu.core_type<tc>, window_params = [{transform_indices = @transform_0, window_bounds = array<i64: 16, 32>}, {transform_indices = @transform_1, window_bounds = array<i64: 32, 128>}, {transform_indices = @transform_2, window_bounds = array<i64: 1, 128>}, {transform_indices = @transform_3, window_bounds = array<i64: 16, 128>}]} {
    %c0 = arith.constant 0 : index
    %c0_0 = arith.constant 0 : index
    %0 = vector.load %arg2[%c0, %c0_0] : memref<16x32xf32, #tpu.memory_space<vmem>>, vector<16x32xf32>
    %c0_1 = arith.constant 0 : index
    %c0_2 = arith.constant 0 : index
    %1 = vector.load %arg3[%c0_1, %c0_2] : memref<32x128xf32, #tpu.memory_space<vmem>>, vector<32x128xf32>
    %cst = arith.constant dense<0.000000e+00> : vector<16x128xf32>
    %2 = tpu.matmul %0, %1, %cst {dimension_numbers = #tpu.dot_dimension_numbers<[1], [0], [0], [1], [0, 0, 1, 1], [], []>} : vector<16x32xf32>, vector<32x128xf32>, vector<16x128xf32> -> vector<16x128xf32>
    %c0_3 = arith.constant 0 : index
    %c0_4 = arith.constant 0 : index
    %3 = vector.load %arg4[%c0_3, %c0_4] : memref<1x128xf32, #tpu.memory_space<vmem>>, vector<1x128xf32>
    %4 = vector.broadcast %3 : vector<1x128xf32> to vector<16x128xf32>
    %5 = arith.addf %2, %4 : vector<16x128xf32>
    %c0_5 = arith.constant 0 : index
    %c0_6 = arith.constant 0 : index
    %6 = vector.load %arg5[%c0_5, %c0_6] : memref<16x128xf32, #tpu.memory_space<vmem>>, vector<16x128xf32>
    tpu.vector_store %arg5[%c0_5, %c0_6], %5 {strides = array<i32>} : memref<16x128xf32, #tpu.memory_space<vmem>>, vector<16x128xf32>,
    return
  }
  func.func @transform_0(%arg0: i32, %arg1: i32) -> (i32, i32) {
    %c0_i32 = arith.constant 0 : i32
    %c0_i32_0 = arith.constant 0 : i32
    return %arg0, %c0_i32 : i32, i32
  }
  func.func @transform_1(%arg0: i32, %arg1: i32) -> (i32, i32) {
    %c0_i32 = arith.constant 0 : i32
    %c0_i32_0 = arith.constant 0 : i32
    return %c0_i32, %arg1 : i32, i32
  }
  func.func @transform_2(%arg0: i32, %arg1: i32) -> (i32, i32) {
    %c0_i32 = arith.constant 0 : i32
    %c0_i32_0 = arith.constant 0 : i32
    return %c0_i32, %arg1 : i32, i32
  }
  func.func @transform_3(%arg0: i32, %arg1: i32) -> (i32, i32) {
    %c0_i32 = arith.constant 0 : i32
    return %arg0, %arg1 : i32, i32
  }
}

</mosaic_0001>

<bundles_post_ra>
// kernel: tpu_custom_call.1
= control target key start
LH: loop header
LB: loop body
LE: loop exit
PB: predicated region body
PF: predicated region fallthrough
CT: control target
= control target key end

     0   :  { %8 = vsyncpa [#allocation3], 0  ;;  %s245_s0 = inlined_call_operand.hbm [shape: f32[16,32], index: 0, kind: input, shape index: {}]   ;;  %s246_s1 = inlined_call_operand.hbm [shape: f32[32,128], index: 1, kind: input, shape index: {}]   ;;  %s247_s2 = inlined_call_operand.vmem [shape: f32[1,128], index: 2, kind: input, shape index: {}]   ;;  %s248_s3 = inlined_call_operand.hbm [shape: f32[16,128], index: 3, kind: output, shape index: {}]  }
   0x1   :  { %9 = vsyncpa [#allocation6], 0 }
   0x2   :  { %10 = vsyncpa [#allocation4], 0  ;;  %s15_s14 = sshll.u32 %s245_s0, 4  ;;  %s199_s15 = smov [#allocation2]   ;;  %s16_s14 = int_to_ptr.hbm [resolvable:$true] %s15_s14 }
   0x3   :  { %s17_s16 = sshll.u32 %s199_s15, 4  ;;  %s28_s19 = sshll.u32 %s246_s1, 4  ;;  %s18_s16 = int_to_ptr.vmem [resolvable:$true] %s17_s16  ;;  %s29_s19 = int_to_ptr.hbm [resolvable:$true] %s28_s19 }
   0x4   :  { %s200_s20 = smov 128   ;;  %s201_s21 = smov 8  }
   0x5   :  { %23 = dma.hbm_to_vmem [thread:$0]  %s16_s14, 256, %s18_s16, [#allocation3], %s200_s20, %s200_s20, %s201_s21  }
   0x6   :  { %s202_s22 = smov [#allocation5]  }
   0x7   :  { %s30_s23 = sshll.u32 %s202_s22, 4  ;;  %s31_s23 = int_to_ptr.vmem [resolvable:$true] %s30_s23 }
   0x8   :  { %36 = dma.hbm_to_vmem [thread:$0]  %s29_s19, 512, %s31_s23, [#allocation6], %s200_s20, %s200_s20, %s201_s21  }
   0x9   :  { %193 = dma.done.wait [#allocation3], 256  }
   0xa   :  { %194 = vsyncadd [#allocation3], 4294967040 }
   0xb   :  { %195 = dma.done.wait [#allocation6], 512  }
   0xc   :  { %196 = vsyncadd [#allocation6], 4294966784  ;;  %v52_v0 = vld [vmem:[#allocation5 + $0x18] sm:$0xff]  ;;  %v51_v1 = vld [vmem:[#allocation5 + $0x10] sm:$0xff]  ;;  %vm57_vm0 = vcmask 261120   ;;  %s203_s24 = smov [#allocation7]  }
   0xd   :  { %76 = vmatpush.msra.mxu0 %v52_v0  ;;  %111 = vmatpush.msra.mxu1 %v52_v0  ;;  %v50_v2 = vld [vmem:[#allocation5 + $0x8] sm:$0xff]  ;;  %v49_v3 = vld [vmem:[#allocation5] sm:$0xff]  ;;  %v47_v4 = vld [vmem:[#allocation2] sm:$0xff]  ;;  %s93_s25 = sshll.u32 %s203_s24, 4  ;;  %s95_s28 = sshll.u32 %s248_s3, 4  ;;  %s94_s25 = int_to_ptr.vmem [resolvable:$true] %s93_s25  ;;  %s96_s28 = int_to_ptr.hbm [resolvable:$true] %s95_s28 }
   0xe   :  { %v48_v5 = vld [vmem:[#allocation2 + $0x8] sm:$0xff]  ;;  %v120_v6 = vld [vmem:[%s247_s2] ss:$0 sm:$0xff] }
   0xf   :  { %77 = vmatpush.msra.mxu0 %v51_v1  ;;  %112 = vmatpush.msra.mxu1 %v51_v1 }
  0x11   :  { %78 = vmatpush.msra.mxu0 %v50_v2  ;;  %113 = vmatpush.msra.mxu1 %v50_v2 }
  0x13   :  { %79 = vmatpush.msra.mxu0 %v49_v3  ;;  %114 = vmatpush.msra.mxu1 %v49_v3 }
  0x14   :  { %109 = vmatmul.msk.f32.vlgmr.msra.gmra.mxu0 %vm57_vm0, %v47_v4  ;;  %110 = vmatmul.msk.f32.vlgmr.msra.gmra.mxu1 %vm57_vm0, %v48_v5 }
  0x91   :  { %v81_v7 = vpop.f32.mrf.mxu0  ;;  %v84_v8 = vpop.f32.mrf.mxu1 }
  0x92   :  { %v82_v9 = vadd.f32 %v120_v6, %v81_v7  ;;  %v85_v10 = vadd.f32 %v120_v6, %v84_v8 }
  0x94   :  { %87 = vst [vmem:[#allocation7] sm:$0xff] %v82_v9 }
  0x95   :  { %88 = vst [vmem:[#allocation7 + $0x8] sm:$0xff] %v85_v10 }
  0x96   :  { %101 = dma.vmem_to_hbm [thread:$0]  %s94_s25, 256, %s96_s28, [#allocation4], %s200_s20, %s200_s20, %s201_s21  }
  0x97   :  { %197 = dma.done.wait [#allocation4], 256  }
  0x98   :  { %198 = vsyncadd [#allocation4], 4294967040 }
  0x99   :  { %106 = vsyncpa [#allocation3], 1 }
  0x9a   :  { %107 = vsyncpa [#allocation6], 1 }
  0x9b   :  { %108 = vsyncpa [#allocation4], 1 }

</bundles_post_ra>
